<compile_context>
chip_gen: v6e
topology: v6e:2x2x1
jax: 0.10.0
libtpu: 0.0.40
codegen_flags: <defaults>
</compile_context>

<pallas_src>
import functools

import jax
import jax.numpy as jnp
from jax.experimental import pallas as pl
from jax.experimental.pallas import tpu as pltpu


def _round_up(x, m):
    return ((x + m - 1) // m) * m


def rmgc_kernel(x_ref, w1_ref, b1_ref, w2_ref, b2_ref, o_ref, *, act):
    # --- linear_1 on the MXU: bf16 operands (cast in-kernel), f32 accumulation ---
    x = x_ref[...].astype(jnp.bfloat16)
    h = jnp.dot(x, w1_ref[...], preferred_element_type=jnp.float32)
    h = h + b1_ref[...]
    # --- act_func (f32 VPU math; v5e has no bf16 VPU/EUP path) ---
    if act == "relu":
        h = jnp.maximum(h, 0.0)
    else:  # leaky_relu (PyTorch default negative_slope = 0.01)
        h = jnp.where(h >= 0.0, h, 0.01 * h)
    # --- dropout: identity at inference (module in eval mode) ---
    # TODO(synk): training-mode dropout (pltpu.prng_random_bits mask) not emitted.
    # --- linear_2 on the MXU ---
    z = jnp.dot(h.astype(jnp.bfloat16), w2_ref[...],
                preferred_element_type=jnp.float32)
    z = z + b2_ref[...]
    # --- log_softmax over the class axis (dim=1 of the 2-D input == last axis) ---
    m = jnp.max(z, axis=-1, keepdims=True)
    zs = z - m
    lse = jnp.log(jnp.sum(jnp.exp(zs), axis=-1, keepdims=True))
    o_ref[...] = (zs - lse).astype(o_ref.dtype)


def _vmem_cap_bytes():
    """Generation-aware VMEM budget (leave headroom for compiler scratch)."""
    try:
        phys = int(pltpu.get_tpu_info().vmem_capacity_bytes)
    except Exception:
        phys = 64 << 20  # conservative fallback: assume v7x-sized VMEM
    return max(int(phys * 0.85), 16 << 20)


@functools.partial(
    jax.jit, static_argnames=("act", "block_rows", "single_buffer_weights"))
def _rmgc_forward_impl(x, w1, b1, w2, b2, *, act, block_rows,
                       single_buffer_weights):
    N, F = x.shape
    H = w1.shape[1]
    C = w2.shape[1]

    # Lane-dense hidden axis (multiple of 128); padded columns/rows are zero so they
    # contribute exactly 0 through relu/leaky_relu and the second matmul.
    H_pad = _round_up(H, 128)

    # Row tiling: keep >= 4 grid steps when N allows (>= 2 per v7x TensorCore so the
    # streamed x-tile DMA stays double-buffered); 16-row alignment for bf16 packing.
    row_align = 16
    min_steps = 4
    cap_rows = max(row_align, _round_up(pl.cdiv(N, min_steps), row_align))
    block_rows = max(row_align, min(_round_up(block_rows, row_align), cap_rows))

    wbuf = 1 if single_buffer_weights else 2
    xbytes = x.dtype.itemsize

    def vmem_needed(br):
        return (2 * br * F * xbytes                            # x tiles (2 buffers)
                + 2 * br * C * 4                               # out tiles (f32)
                + wbuf * (F * H_pad * 2 + H_pad * C * 2 + (H_pad + C) * 4)  # weights
                + br * (F * 2 + H_pad * 6 + C * 4))            # in-kernel temporaries

    vmem_cap = _vmem_cap_bytes()
    while vmem_needed(block_rows) > vmem_cap and block_rows > row_align:
        block_rows = max(row_align, ((block_rows // 2) // row_align) * row_align)
    # TODO(synk): if resident W1/W2 alone exceed the VMEM budget (very large F*H),
    # add a K-tiled accumulator grid axis instead of shrinking block_rows further.

    grid = (pl.cdiv(N, block_rows),)  # partial last block: OOB output rows are dropped

    # Pad + cast the (small, resident) weights; biases stay f32.
    w1_p = jnp.pad(w1, ((0, 0), (0, H_pad - H))).astype(jnp.bfloat16)
    b1_p = jnp.pad(b1.reshape(1, -1).astype(jnp.float32), ((0, 0), (0, H_pad - H)))
    w2_p = jnp.pad(w2, ((0, H_pad - H), (0, 0))).astype(jnp.bfloat16)
    b2_p = b2.reshape(1, -1).astype(jnp.float32)

    # Resident (constant index_map) operands: single-buffered to halve their VMEM.
    resident = dict(pipeline_mode=pl.Buffered(1)) if single_buffer_weights else {}
    in_specs = [
        pl.BlockSpec((block_rows, F), lambda i: (i, 0)),            # x (streamed)
        pl.BlockSpec((F, H_pad), lambda i: (0, 0), **resident),     # W1 (resident)
        pl.BlockSpec((1, H_pad), lambda i: (0, 0), **resident),     # b1
        pl.BlockSpec((H_pad, C), lambda i: (0, 0), **resident),     # W2
        pl.BlockSpec((1, C), lambda i: (0, 0), **resident),         # b2
    ]
    out_spec = pl.BlockSpec((block_rows, C), lambda i: (i, 0))      # unpadded (N, C)

    vmem_limit = int(min(max(vmem_needed(block_rows) * 1.5 + (4 << 20), 16 << 20),
                         vmem_cap))

    cost = pl.CostEstimate(
        flops=2 * N * (F * H_pad + H_pad * C),
        transcendentals=N * C,                                   # exp in log_softmax
        bytes_accessed=(N * F * xbytes + N * C * 4
                        + w1_p.size * 2 + w2_p.size * 2 + (H_pad + C) * 4),
    )

    return pl.pallas_call(
        functools.partial(rmgc_kernel, act=act),
        out_shape=jax.ShapeDtypeStruct((N, C), jnp.float32),
        grid_spec=pltpu.PrefetchScalarGridSpec(
            num_scalar_prefetch=0,
            grid=grid,
            in_specs=in_specs,
            out_specs=out_spec,
        ),
        compiler_params=pltpu.CompilerParams(
            dimension_semantics=("parallel",),
            vmem_limit_bytes=vmem_limit,
        ),
        cost_estimate=cost,
    )(x, w1_p, b1_p, w2_p, b2_p)


_SINGLE_BUFFER_OK = None  # lazily feature-detect pl.Buffered(1) on resident operands


def rmgc_forward(x, w1, b1, w2, b2, *, act="relu", block_rows=512):
    """x: (N, F); w1: (F, H); b1: (H,); w2: (H, C); b2: (C,).  Returns (N, C) f32.

    Weights are pre-transposed (in_features, out_features) so the kernel computes
    x @ W + b, matching PyTorch's x @ W.T + b.
    """
    global _SINGLE_BUFFER_OK
    if _SINGLE_BUFFER_OK is None:
        try:
            out = _rmgc_forward_impl(x, w1, b1, w2, b2, act=act,
                                     block_rows=block_rows,
                                     single_buffer_weights=True)
            jax.block_until_ready(out)
            _SINGLE_BUFFER_OK = True
            return out
        except Exception:
            # This JAX build rejects pl.Buffered(1) on resident operands.
            _SINGLE_BUFFER_OK = False
    return _rmgc_forward_impl(x, w1, b1, w2, b2, act=act, block_rows=block_rows,
                              single_buffer_weights=_SINGLE_BUFFER_OK)


def rmgc_reference_f32(x, w1, b1, w2, b2, act="relu"):
    h = x @ w1 + b1
    h = jnp.maximum(h, 0.0) if act == "relu" else jnp.where(h >= 0, h, 0.01 * h)
    z = h @ w2 + b2
    return jax.nn.log_softmax(z, axis=1)


def rmgc_reference_bf16(x, w1, b1, w2, b2, act="relu"):
    # Mirrors the kernel's precision policy (bf16 MXU operands, f32 accumulation).
    h = jnp.dot(x.astype(jnp.bfloat16), w1.astype(jnp.bfloat16),
                preferred_element_type=jnp.float32) + b1
    h = jnp.maximum(h, 0.0) if act == "relu" else jnp.where(h >= 0, h, 0.01 * h)
    z = jnp.dot(h.astype(jnp.bfloat16), w2.astype(jnp.bfloat16),
                preferred_element_type=jnp.float32) + b2
    return jax.nn.log_softmax(z, axis=1)


if __name__ == "__main__":
    # Small shapes consistent with the module; deliberately non-multiples of the tile
    # sizes to exercise the partial-block and weight-padding paths.
    N, n_feat, n_hid, n_class = 50, 40, 32, 10

    key = jax.random.PRNGKey(0)
    kx, kw1, kb1, kw2, kb2 = jax.random.split(key, 5)

    x = jax.random.normal(kx, (N, n_feat), dtype=jnp.float32)
    # PyTorch Linear weight is (out, in); the kernel takes the transpose (in, out).
    w1 = jax.random.normal(kw1, (n_feat, n_hid), dtype=jnp.float32) * 0.1
    b1 = jax.random.normal(kb1, (n_hid,), dtype=jnp.float32) * 0.1
    w2 = jax.random.normal(kw2, (n_hid, n_class), dtype=jnp.float32) * 0.1
    b2 = jax.random.normal(kb2, (n_class,), dtype=jnp.float32) * 0.1

    out = jax.block_until_ready(rmgc_forward(x, w1, b1, w2, b2, act="relu"))

    assert out.shape == (N, n_class)
    assert bool(jnp.all(jnp.isfinite(out)))

    ref_bf16 = rmgc_reference_bf16(x, w1, b1.reshape(1, -1), w2, b2.reshape(1, -1))
    ref_f32 = rmgc_reference_f32(x, w1, b1.reshape(1, -1), w2, b2.reshape(1, -1))
    assert jnp.allclose(out, ref_bf16, atol=1e-3, rtol=1e-3), "mismatch vs bf16-matched reference"
    assert jnp.allclose(out, ref_f32, atol=5e-2, rtol=5e-2), "mismatch vs f32 reference"

    print("KERNEL_OK")
</pallas_src>

<mosaic_0001>
module attributes {stable_mosaic.version = 11 : i64} {
  func.func @rmgc_kernel(%arg0: i32, %arg1: memref<16x40xf32, #tpu.memory_space<vmem>>, %arg2: memref<40x128xbf16, #tpu.memory_space<vmem>>, %arg3: memref<1x128xf32, #tpu.memory_space<vmem>>, %arg4: memref<128x10xbf16, #tpu.memory_space<vmem>>, %arg5: memref<1x10xf32, #tpu.memory_space<vmem>>, %arg6: memref<16x10xf32, #tpu.memory_space<vmem>>) attributes {dimension_semantics = [#tpu.dimension_semantics<parallel>], iteration_bounds = array<i64: 4>, scalar_prefetch = 0 : i64, scratch_operands = 0 : i64, tpu.core_type = #tpu.core_type<tc>, window_params = [{transform_indices = @transform_0, window_bounds = array<i64: 16, 40>}, {pipeline_mode = #tpu.pipeline_mode<synchronous>, transform_indices = @transform_1, window_bounds = array<i64: 40, 128>}, {pipeline_mode = #tpu.pipeline_mode<synchronous>, transform_indices = @transform_2, window_bounds = array<i64: 1, 128>}, {pipeline_mode = #tpu.pipeline_mode<synchronous>, transform_indices = @transform_3, window_bounds = array<i64: 128, 10>}, {pipeline_mode = #tpu.pipeline_mode<synchronous>, transform_indices = @transform_4, window_bounds = array<i64: 1, 10>}, {transform_indices = @transform_5, window_bounds = array<i64: 16, 10>}]} {
    %c0 = arith.constant 0 : index
    %c0_0 = arith.constant 0 : index
    %0 = vector.load %arg1[%c0, %c0_0] : memref<16x40xf32, #tpu.memory_space<vmem>>, vector<16x40xf32>
    %1 = arith.truncf %0 : vector<16x40xf32> to vector<16x40xbf16>
    %c0_1 = arith.constant 0 : index
    %c0_2 = arith.constant 0 : index
    %2 = vector.load %arg2[%c0_1, %c0_2] : memref<40x128xbf16, #tpu.memory_space<vmem>>, vector<40x128xbf16>
    %cst = arith.constant dense<0.000000e+00> : vector<16x128xf32>
    %3 = tpu.matmul %1, %2, %cst {dimension_numbers = #tpu.dot_dimension_numbers<[1], [0], [0], [1], [0, 0, 1, 1], [], []>} : vector<16x40xbf16>, vector<40x128xbf16>, vector<16x128xf32> -> vector<16x128xf32>
    %c0_3 = arith.constant 0 : index
    %c0_4 = arith.constant 0 : index
    %4 = vector.load %arg3[%c0_3, %c0_4] : memref<1x128xf32, #tpu.memory_space<vmem>>, vector<1x128xf32>
    %5 = vector.broadcast %4 : vector<1x128xf32> to vector<16x128xf32>
    %6 = arith.addf %3, %5 : vector<16x128xf32>
    %cst_5 = arith.constant 0.000000e+00 : f32
    %7 = vector.broadcast %cst_5 : f32 to vector<16x128xf32>
    %8 = arith.maximumf %6, %7 : vector<16x128xf32>
    %9 = arith.truncf %8 : vector<16x128xf32> to vector<16x128xbf16>
    %c0_6 = arith.constant 0 : index
    %c0_7 = arith.constant 0 : index
    %10 = vector.load %arg4[%c0_6, %c0_7] : memref<128x10xbf16, #tpu.memory_space<vmem>>, vector<128x10xbf16>
    %cst_8 = arith.constant dense<0.000000e+00> : vector<16x10xf32>
    %11 = tpu.matmul %9, %10, %cst_8 {dimension_numbers = #tpu.dot_dimension_numbers<[1], [0], [0], [1], [0, 0, 1, 1], [], []>} : vector<16x128xbf16>, vector<128x10xbf16>, vector<16x10xf32> -> vector<16x10xf32>
    %c0_9 = arith.constant 0 : index
    %c0_10 = arith.constant 0 : index
    %12 = vector.load %arg5[%c0_9, %c0_10] : memref<1x10xf32, #tpu.memory_space<vmem>>, vector<1x10xf32>
    %13 = vector.broadcast %12 : vector<1x10xf32> to vector<16x10xf32>
    %14 = arith.addf %11, %13 : vector<16x10xf32>
    %cst_11 = arith.constant dense<0xFF800000> : vector<16xf32>
    %15 = vector.multi_reduction <maximumf>, %14, %cst_11 [1] : vector<16x10xf32> to vector<16xf32>
    %16 = vector.shape_cast %15 : vector<16xf32> to vector<16x1xf32>
    %17 = vector.broadcast %16 : vector<16x1xf32> to vector<16x10xf32>
    %18 = arith.subf %14, %17 : vector<16x10xf32>
    %19 = math.exp %18 : vector<16x10xf32>
    %cst_12 = arith.constant dense<0.000000e+00> : vector<16xf32>
    %20 = vector.multi_reduction <add>, %19, %cst_12 [1] : vector<16x10xf32> to vector<16xf32>
    %21 = vector.shape_cast %20 : vector<16xf32> to vector<16x1xf32>
    %22 = math.log %21 : vector<16x1xf32>
    %23 = vector.broadcast %22 : vector<16x1xf32> to vector<16x10xf32>
    %24 = arith.subf %18, %23 : vector<16x10xf32>
    %c0_13 = arith.constant 0 : index
    %c0_14 = arith.constant 0 : index
    %25 = vector.load %arg6[%c0_13, %c0_14] : memref<16x10xf32, #tpu.memory_space<vmem>>, vector<16x10xf32>
    tpu.vector_store %arg6[%c0_13, %c0_14], %24 {strides = array<i32>} : memref<16x10xf32, #tpu.memory_space<vmem>>, vector<16x10xf32>,
    return
  }
  func.func @transform_0(%arg0: i32) -> (i32, i32) {
    %c0_i32 = arith.constant 0 : i32
    %c0_i32_0 = arith.constant 0 : i32
    return %arg0, %c0_i32 : i32, i32
  }
  func.func @transform_1(%arg0: i32) -> (i32, i32) {
    %c0_i32 = arith.constant 0 : i32
    %c0_i32_0 = arith.constant 0 : i32
    %c0_i32_1 = arith.constant 0 : i32
    return %c0_i32, %c0_i32_0 : i32, i32
  }
  func.func @transform_2(%arg0: i32) -> (i32, i32) {
    %c0_i32 = arith.constant 0 : i32
    %c0_i32_0 = arith.constant 0 : i32
    %c0_i32_1 = arith.constant 0 : i32
    return %c0_i32, %c0_i32_0 : i32, i32
  }
  func.func @transform_3(%arg0: i32) -> (i32, i32) {
    %c0_i32 = arith.constant 0 : i32
    %c0_i32_0 = arith.constant 0 : i32
    %c0_i32_1 = arith.constant 0 : i32
    return %c0_i32, %c0_i32_0 : i32, i32
  }
  func.func @transform_4(%arg0: i32) -> (i32, i32) {
    %c0_i32 = arith.constant 0 : i32
    %c0_i32_0 = arith.constant 0 : i32
    %c0_i32_1 = arith.constant 0 : i32
    return %c0_i32, %c0_i32_0 : i32, i32
  }
  func.func @transform_5(%arg0: i32) -> (i32, i32) {
    %c0_i32 = arith.constant 0 : i32
    %c0_i32_0 = arith.constant 0 : i32
    return %arg0, %c0_i32 : i32, i32
  }
}

module attributes {stable_mosaic.version = 11 : i64} {
  func.func @rmgc_kernel(%arg0: i32, %arg1: memref<16x40xf32, #tpu.memory_space<vmem>>, %arg2: memref<40x128xbf16, #tpu.memory_space<vmem>>, %arg3: memref<1x128xf32, #tpu.memory_space<vmem>>, %arg4: memref<128x10xbf16, #tpu.memory_space<vmem>>, %arg5: memref<1x10xf32, #tpu.memory_space<vmem>>, %arg6: memref<16x10xf32, #tpu.memory_space<vmem>>) attributes {dimension_semantics = [#tpu.dimension_semantics<parallel>], iteration_bounds = array<i64: 4>, scalar_prefetch = 0 : i64, scratch_operands = 0 : i64, tpu.core_type = #tpu.core_type<tc>, window_params = [{transform_indices = @transform_0, window_bounds = array<i64: 16, 40>}, {pipeline_mode = #tpu.pipeline_mode<synchronous>, transform_indices = @transform_1, window_bounds = array<i64: 40, 128>}, {pipeline_mode = #tpu.pipeline_mode<synchronous>, transform_indices = @transform_2, window_bounds = array<i64: 1, 128>}, {pipeline_mode = #tpu.pipeline_mode<synchronous>, transform_indices = @transform_3, window_bounds = array<i64: 128, 10>}, {pipeline_mode = #tpu.pipeline_mode<synchronous>, transform_indices = @transform_4, window_bounds = array<i64: 1, 10>}, {transform_indices = @transform_5, window_bounds = array<i64: 16, 10>}]} {
    %c0 = arith.constant 0 : index
    %c0_0 = arith.constant 0 : index
    %0 = vector.load %arg1[%c0, %c0_0] : memref<16x40xf32, #tpu.memory_space<vmem>>, vector<16x40xf32>
    %1 = arith.truncf %0 : vector<16x40xf32> to vector<16x40xbf16>
    %c0_1 = arith.constant 0 : index
    %c0_2 = arith.constant 0 : index
    %2 = vector.load %arg2[%c0_1, %c0_2] : memref<40x128xbf16, #tpu.memory_space<vmem>>, vector<40x128xbf16>
    %cst = arith.constant dense<0.000000e+00> : vector<16x128xf32>
    %3 = tpu.matmul %1, %2, %cst {dimension_numbers = #tpu.dot_dimension_numbers<[1], [0], [0], [1], [0, 0, 1, 1], [], []>} : vector<16x40xbf16>, vector<40x128xbf16>, vector<16x128xf32> -> vector<16x128xf32>
    %c0_3 = arith.constant 0 : index
    %c0_4 = arith.constant 0 : index
    %4 = vector.load %arg3[%c0_3, %c0_4] : memref<1x128xf32, #tpu.memory_space<vmem>>, vector<1x128xf32>
    %5 = vector.broadcast %4 : vector<1x128xf32> to vector<16x128xf32>
    %6 = arith.addf %3, %5 : vector<16x128xf32>
    %cst_5 = arith.constant 0.000000e+00 : f32
    %7 = vector.broadcast %cst_5 : f32 to vector<16x128xf32>
    %8 = arith.maximumf %6, %7 : vector<16x128xf32>
    %9 = arith.truncf %8 : vector<16x128xf32> to vector<16x128xbf16>
    %c0_6 = arith.constant 0 : index
    %c0_7 = arith.constant 0 : index
    %10 = vector.load %arg4[%c0_6, %c0_7] : memref<128x10xbf16, #tpu.memory_space<vmem>>, vector<128x10xbf16>
    %cst_8 = arith.constant dense<0.000000e+00> : vector<16x10xf32>
    %11 = tpu.matmul %9, %10, %cst_8 {dimension_numbers = #tpu.dot_dimension_numbers<[1], [0], [0], [1], [0, 0, 1, 1], [], []>} : vector<16x128xbf16>, vector<128x10xbf16>, vector<16x10xf32> -> vector<16x10xf32>
    %c0_9 = arith.constant 0 : index
    %c0_10 = arith.constant 0 : index
    %12 = vector.load %arg5[%c0_9, %c0_10] : memref<1x10xf32, #tpu.memory_space<vmem>>, vector<1x10xf32>
    %13 = vector.broadcast %12 : vector<1x10xf32> to vector<16x10xf32>
    %14 = arith.addf %11, %13 : vector<16x10xf32>
    %cst_11 = arith.constant dense<0xFF800000> : vector<16xf32>
    %15 = vector.multi_reduction <maximumf>, %14, %cst_11 [1] : vector<16x10xf32> to vector<16xf32>
    %16 = vector.shape_cast %15 : vector<16xf32> to vector<16x1xf32>
    %17 = vector.broadcast %16 : vector<16x1xf32> to vector<16x10xf32>
    %18 = arith.subf %14, %17 : vector<16x10xf32>
    %19 = math.exp %18 : vector<16x10xf32>
    %cst_12 = arith.constant dense<0.000000e+00> : vector<16xf32>
    %20 = vector.multi_reduction <add>, %19, %cst_12 [1] : vector<16x10xf32> to vector<16xf32>
    %21 = vector.shape_cast %20 : vector<16xf32> to vector<16x1xf32>
    %22 = math.log %21 : vector<16x1xf32>
    %23 = vector.broadcast %22 : vector<16x1xf32> to vector<16x10xf32>
    %24 = arith.subf %18, %23 : vector<16x10xf32>
    %c0_13 = arith.constant 0 : index
    %c0_14 = arith.constant 0 : index
    %25 = vector.load %arg6[%c0_13, %c0_14] : memref<16x10xf32, #tpu.memory_space<vmem>>, vector<16x10xf32>
    tpu.vector_store %arg6[%c0_13, %c0_14], %24 {strides = array<i32>} : memref<16x10xf32, #tpu.memory_space<vmem>>, vector<16x10xf32>,
    return
  }
  func.func @transform_0(%arg0: i32) -> (i32, i32) {
    %c0_i32 = arith.constant 0 : i32
    %c0_i32_0 = arith.constant 0 : i32
    return %arg0, %c0_i32 : i32, i32
  }
  func.func @transform_1(%arg0: i32) -> (i32, i32) {
    %c0_i32 = arith.constant 0 : i32
    %c0_i32_0 = arith.constant 0 : i32
    %c0_i32_1 = arith.constant 0 : i32
    return %c0_i32, %c0_i32_0 : i32, i32
  }
  func.func @transform_2(%arg0: i32) -> (i32, i32) {
    %c0_i32 = arith.constant 0 : i32
    %c0_i32_0 = arith.constant 0 : i32
    %c0_i32_1 = arith.constant 0 : i32
    return %c0_i32, %c0_i32_0 : i32, i32
  }
  func.func @transform_3(%arg0: i32) -> (i32, i32) {
    %c0_i32 = arith.constant 0 : i32
    %c0_i32_0 = arith.constant 0 : i32
    %c0_i32_1 = arith.constant 0 : i32
    return %c0_i32, %c0_i32_0 : i32, i32
  }
  func.func @transform_4(%arg0: i32) -> (i32, i32) {
    %c0_i32 = arith.constant 0 : i32
    %c0_i32_0 = arith.constant 0 : i32
    %c0_i32_1 = arith.constant 0 : i32
    return %c0_i32, %c0_i32_0 : i32, i32
  }
  func.func @transform_5(%arg0: i32) -> (i32, i32) {
    %c0_i32 = arith.constant 0 : i32
    %c0_i32_0 = arith.constant 0 : i32
    return %arg0, %c0_i32 : i32, i32
  }
}

</mosaic_0001>

<bundles_post_ra>
// kernel: _rmgc_forward_impl.1
= control target key start
LH: loop header
LB: loop body
LE: loop exit
PB: predicated region body
PF: predicated region fallthrough
CT: control target
= control target key end

     0   :  { %s1001_s18 = smov 0   ;;  %s1003_s19 = smov 0   ;;  %s1129_s0 = inlined_call_operand.vmem [shape: f32[50,40], index: 0, kind: input, shape index: {}]   ;;  %s1130_s1 = inlined_call_operand.vmem [shape: bf16[40,128], index: 1, kind: input, shape index: {}]   ;;  %s1131_s2 = inlined_call_operand.vmem [shape: f32[1,128], index: 2, kind: input, shape index: {}]   ;;  %s1132_s3 = inlined_call_operand.vmem [shape: bf16[128,10], index: 3, kind: input, shape index: {}]   ;;  %s1133_s4 = inlined_call_operand.vmem [shape: f32[1,10], index: 4, kind: input, shape index: {}]   ;;  %s1134_s5 = inlined_call_operand.vmem [shape: f32[50,10], index: 5, kind: output, shape index: {}]  }
   0x1   :  { %s1005_s20 = smov 0  }
   0x2 LB: > { %s1014_s21 = sadd.s32 4294967295, %s935_s20   ;;  %s1016_s22 = sadd.s32 1, %s935_s20   ;;  %s935_s20 = sphi %s1005_s20, %s1138_s20   ;;  %s931_s19 = sphi %s1003_s19, %s1137_s19   ;;  %s927_s18 = sphi %s1001_s18, %s1136_s18  }
   0x3   : > { %s129_s23 = ssub.s32 %s935_s20, %s1016_s22  ;;  %s132_s24 = sadd.s32 1, %s931_s19 }
   0x4   : > { %p130_p0 = scmp.eq.s32.totalorder %s129_s23, 0  ;;  %p142_p1 = scmp.ne.s32.totalorder %s931_s19, %s927_s18 }
   0x5   : > { %p143_p2 = scmp.eq.s32.totalorder %s1014_s21, 3  ;;  %p691_p3 = scmp.ge.s32.totalorder %s935_s20, 1 }
   0x6   : > { %s1024_s25 = scalar_select %p130_p0, %s931_s19, %s132_s24  }
   0x7   : > { %p1026_p4 = por %p143_p2, %p142_p1  ;;  %p196_p5 = scmp.lt.s32.totalorder %s935_s20, 5 }
   0x9   : > { %p197_p6 = pnand %p691_p3, %p196_p5 }
   0xa   : > { %s1037_s6 = sshll.u32 (!%p197_p6), %s1014_s21, 1  ;;  %s224_s16 = sand.u32 (!%p197_p6), 1, %s927_s18  }
   0xb   : > { %200 = sbr.rel (%p197_p6) target bundleno = 786 (0x312), region = 40  ;;  %p232_p7 = scmp.lt.s32.totalorder (!%p197_p6), %s1037_s6, 6 }
   0xc   : > { %s692_s17 = sshll.u32 (!%p197_p6), %s224_s16, 4 }
   0xd   : > { %s1082_s20 = scalar_lea.vmem (!%p197_p6), [#allocation2], %s692_s17  }
  0x10   : > { %v862_v0 = vld [vmem:[%s1130_s1 + $0x10] ss:$0 sps:$4 sm:$0xff]   ;;  %vm281_vm0 = vcmask 1043456   ;;  %v969_v1 = vmov 0.0   ;;  %vm970_vm1 = vmmov 0   ;;  %v863_v3 = vld [vmem:[%s1130_s1 + $0x8] sm:$0xff]  }
  0x11   : > { %742 = vmatprep.subr.bf16.mxu0 %v969_v1  ;;  %752 = vmatprep.subr.bf16.mxu1 %v969_v1  ;;  %v283_v2 = vsel %vm281_vm0, %v862_v0, 0  ;;  %v865_v4 = vld [vmem:[%s1132_s3 + $0x38] sm:$0xff]   ;;  %s233_s9 = scalar_select %p232_p7, %s1037_s6, 6  ;;  %v866_v5 = vld [vmem:[%s1132_s3 + $0x30] sm:$0xff]   ;;  %v864_v6 = vld [vmem:[%s1130_s1] sm:$0xff]   ;;  %vm277_vm2 = vcmask 326656  }
  0x12   : > { %748 = vmatprep.mubr.msk.bf16.mxu0 %vm970_vm1, %v969_v1  ;;  %768 = vmatprep.mubr.msk.bf16.mxu1 %vm970_vm1, %v969_v1  ;;  %v867_v7 = vld [vmem:[%s1132_s3 + $0x28] sm:$0xff]   ;;  %v868_v11 = vld [vmem:[%s1132_s3 + $0x20] sm:$0xff]   ;;  %v869_v12 = vld [vmem:[%s1132_s3 + $0x18] sm:$0xff]   ;;  %vm441_vm3 = vcmask 80896   ;;  %s476_s18 = ssub.s32 (%p1026_p4), 7, %s1037_s6 }
  0x13   : > { %743 = vmatpush3.bf16.msra.mxu0 %v283_v2  ;;  %753 = vmatpush3.bf16.msra.mxu1 %v865_v4  ;;  %s694_s14 = sshll.u32 %s233_s9, 3  ;;  %v870_v13 = vld [vmem:[%s1132_s3 + $0x10] sm:$0xff]   ;;  %v871_v14 = vld [vmem:[%s1132_s3 + $0x8] sm:$0xff]   ;;  %v872_v15 = vld [vmem:[%s1132_s3] sm:$0xff]   ;;  %p477_p8 = scmp.lt.s32.totalorder (%p1026_p4), %s476_s18, 2 }
  0x14   : > { %744 = vmatprep.subr.bf16.mxu0 %v969_v1  ;;  %754 = vmatprep.subr.bf16.mxu1 %v969_v1  ;;  %s235_s23 = scalar_lea.vmem %s1129_s0, %s694_s14  ;;  %v695_v16 = vld [vmem:[%s1131_s2] ss:$0 sm:$0xff] }
  0x15   : > { %v247_v8 = vld [vmem:[%s235_s23] sm:$0xff]  ;;  %v248_v9 = vld [vmem:[%s235_s23 + $0x8] sm:$0xff]  ;;  %s726_s23 = sshll.u32 (%p1026_p4), %s1014_s21, 4 }
  0x16   : > { %v249_v10 = vpack.c.bf16 %v248_v9, %v247_v8  ;;  %v700_v26 = vld [vmem:[%s1133_s4] ss:$0 sm:$0xff]  ;;  %s1095_s28 = scalar_lea.vmem (%p1026_p4), %s1134_s5, %s726_s23  }
  0x17   : > { %745 = vmatpush3.bf16.msra.mxu0 %v863_v3  ;;  %755 = vmatpush3.bf16.msra.mxu1 %v866_v5 }
  0x18   : > { %746 = vmatprep.subr.bf16.mxu0 %v969_v1  ;;  %756 = vmatprep.subr.bf16.mxu1 %v969_v1 }
  0x1b   : > { %747 = vmatpush3.bf16.msra.mxu0 %v864_v6  ;;  %757 = vmatpush3.bf16.msra.mxu1 %v867_v7 }
  0x1c   : > { %758 = vmatprep.subr.bf16.mxu1 %v969_v1 }
  0x1e   : > { %749 = vmatmul.mubr.msk.bf16.vlgmr.msra.gmra.mxu0 %vm277_vm2, %v249_v10 }
  0x1f   : > { %759 = vmatpush3.bf16.msra.mxu1 %v868_v11 }
  0x20   : > { %760 = vmatprep.subr.bf16.mxu1 %v969_v1 }
  0x23   : > { %761 = vmatpush3.bf16.msra.mxu1 %v869_v12 }
  0x24   : > { %762 = vmatprep.subr.bf16.mxu1 %v969_v1 }
  0x27   : > { %763 = vmatpush3.bf16.msra.mxu1 %v870_v13 }
  0x28   : > { %764 = vmatprep.subr.bf16.mxu1 %v969_v1 }
  0x2b   : > { %765 = vmatpush3.bf16.msra.mxu1 %v871_v14 }
  0x2c   : > { %766 = vmatprep.subr.bf16.mxu1 %v969_v1 }
  0x2f   : > { %767 = vmatpush3.bf16.msra.mxu1 %v872_v15 }
  0xde   : > { %v319_v17 = vpop.f32.mrf.mxu0 }
  0xdf   : > { %v320_v19 = vadd.f32 %v695_v16, %v319_v17 }
  0xe0   : > { %v750_v18 = vpop.f32.mrf.mxu0 }
  0xe1   : > { %v326_v23 = vmax.f32 %v320_v19, 0.0 }
  0xe2   : > { %v322_v20 = vpop.f32.mrf.mxu0 }
  0xe3   : > { %v323_v21 = vadd.f32 %v695_v16, %v322_v20 }
  0xe4   : > { %v751_v22 = vpop.f32.mrf.mxu0 }
  0xe5   : > { %v327_v24 = vmax.f32 %v323_v21, 0.0 }
  0xe7   : > { %v328_v25 = vpack.c.bf16 %v327_v24, %v326_v23 }
  0xe9   : > { %769 = vmatmul.mubr.bf16.vlgmr.msra.gmra.mxu1 %v328_v25 }
 0x1a9   : > { %v434_v27 = vpop.f32.mrf.mxu1 }
 0x1aa   : > { %v435_v28 = vadd.f32 %v700_v26, %v434_v27 }
 0x1ab   : > { %v770_v29 = vpop.f32.mrf.mxu1 }
 0x1ac   : > { %v442_v30 = vsel %vm441_vm3, %v435_v28, -inf }
 0x1ad   : > { %443 = vmax.xlane.f32.xlu0 %v442_v30  ;;  %v437_v31 = vpop.f32.mrf.mxu1 }
 0x1ae   : > { %v438_v32 = vadd.f32 %v700_v26, %v437_v31 }
 0x1af   : > { %v771_v33 = vpop.f32.mrf.mxu1 }
 0x1b0   : > { %v445_v34 = vsel %vm441_vm3, %v438_v32, -inf }
 0x1b1   : > { %446 = vmax.xlane.f32.xlu0 %v445_v34 }
 0x236   : > { %v444_v35 = vpop.xlane.xlu0 %443 }
 0x237   : > { %v448_v36 = vsub.f32 %v435_v28, %v444_v35 }
 0x239   : > { %v450_v37 = vmul.f32 1.442695, %v448_v36 }
 0x23a   : > { %v447_v38 = vpop.xlane.xlu0 %446 }
 0x23b   : > { %873 = vpow2.f32 %v450_v37  ;;  %v449_v39 = vsub.f32 %v438_v32, %v447_v38 }
 0x23d   : > { %v452_v40 = vmul.f32 1.442695, %v449_v39 }
 0x23f   : > { %875 = vpow2.f32 %v452_v40 }
 0x248   : > { %v874_v41 = vpop.eup %873 }
 0x249   : > { %v454_v42 = vsel %vm441_vm3, %v874_v41, 0.0 }
 0x24a   : > { %455 = vadd.xlane.f32.xlu1 %v454_v42 }
 0x24c   : > { %v876_v43 = vpop.eup %875 }
 0x24d   : > { %v457_v44 = vsel %vm441_vm3, %v876_v43, 0.0 }
 0x24e   : > { %458 = vadd.xlane.f32.xlu1 %v457_v44 }
 0x2d3   : > { %v456_v45 = vpop.xlane.xlu1 %455 }
 0x2d4   : > { %877 = vlog2.f32 %v456_v45 }
 0x2d7   : > { %v459_v46 = vpop.xlane.xlu1 %458 }
 0x2d8   : > { %879 = vlog2.f32 %v459_v46 }
 0x2e1   : > { %v878_v47 = vpop.eup %877 }
 0x2e2   : > { %v461_v48 = vmul.f32 0.6931472, %v878_v47 }
 0x2e4   : > { %v464_v49 = vsub.f32 %v448_v36, %v461_v48 }
 0x2e5   : > { %v880_v50 = vpop.eup %879 }
 0x2e6   : > { %466 = vst.msk [vmem:[%s1082_s20] sm:$0xff] %vm441_vm3, %v464_v49  ;;  %v463_v51 = vmul.f32 0.6931472, %v880_v50  ;;  %474 = sbr.rel (!%p1026_p4) target bundleno = 786 (0x312), region = 44 }
 0x2e8   : > { %v465_v52 = vsub.f32 %v449_v39, %v463_v51 }
 0x2ea   : > { %467 = vst.msk [vmem:[%s1082_s20 + $0x8] sm:$0xff] %vm441_vm3, %v465_v52 }
 0x2eb   : > { %s1140_s18 = smov (!%p477_p8, %s476_s18), 2 }
 0x2ec   : > { %s711_s29 = sshll.u32 %s1140_s18, 7 }
 0x2ed   : > { %p714_p9 = scmp.eq.s32.totalorder %s711_s29, 0 }
 0x2ee   : > { %s1101_s30 = sshrl.u32 (!%p714_p9), %s1140_s18, 1 }
 0x2ef   : > { %485 = sbr.rel (%p714_p9) target bundleno = 786 (0x312), region = 48  ;;  %p715_p10 = scmp.le.s32.totalorder (!%p714_p9), %s1101_s30, 0 }
 0x2f4   : > { %644 = sbr.rel (%p715_p10) target bundleno = 769 (0x301), region = 124  ;;  %s937_s21 = smov (!%p715_p10), %s1095_s28  }
 0x2f5   : > { %s941_s26 = smov (!%p715_p10), %s1082_s20   ;;  %s945_s6 = smov (!%p715_p10), 0  }
 0x2f6   : > { %s949_s7 = smov (!%p715_p10), 0  }
 0x2f9 LB: >> { %v550_v53 = vld [vmem:[%s943_s26] sm:$0xff]  ;;  %v552_v54 = vld [vmem:[%s943_s26 + $0x8] sm:$0xff]  ;;  %s554_s8 = sadd.s32 1, %s947_s6  ;;  %s544_s7 = sadd.s32 1, %s951_s7   ;;  %s951_s7 = sphi %s949_s7, %s544_s7   ;;  %s947_s6 = sphi %s945_s6, %s946_s6   ;;  %s943_s26 = sphi %s941_s26, %s559_s26   ;;  %s939_s21 = sphi %s937_s21, %s560_s21  }
 0x2fa   : >> { %551 = vst [vmem:[%s939_s21] sm:$0xff] %v550_v53  ;;  %553 = vst [vmem:[%s939_s21 + $0x8] sm:$0xff] %v552_v54  ;;  %p555_p11 = scmp.ge.s32.totalorder %s554_s8, %s1101_s30  ;;  %p543_p12 = scmp.ge.s32.totalorder %s544_s7, %s1101_s30 }
 0x2fc   : >> { %s1142_s8 = smov (%p555_p11, %s554_s8), 0  ;;  %546 = sbr.rel (!%p543_p12) target bundleno = 761 (0x2f9), region = 130 }
 0x2fd   : >> { %s716_s9 = sshll.u32 %s1142_s8, 4  ;;  %s946_s6 = smov %s1142_s8  }
 0x2fe   : >> { %s559_s26 = scalar_lea.vmem %s1082_s20, %s716_s9 [#allocation2]   ;;  %s560_s21 = scalar_lea.vmem %s1095_s28, %s716_s9  }
 0x301 PF: > { %s1111_s10 = sand.u32 1, %s1140_s18   ;;  %s727_s11 = sshll.u32 %s1101_s30, 4 }
 0x302   : > { %s565_s12 = scalar_lea.vmem %s1082_s20, %s727_s11 [#allocation2]   ;;  %s567_s13 = scalar_lea.vmem %s1095_s28, %s727_s11  }
 0x303   : > { %p721_p13 = scmp.le.s32.totalorder %s1111_s10, 0 }
 0x304   : > { %s953_s14 = smov (!%p721_p13), %s567_s13   ;;  %s957_s15 = smov (!%p721_p13), %s565_s12  }
 0x305   : > { %658 = sbr.rel (%p721_p13) target bundleno = 786 (0x312), region = 135  ;;  %s961_s16 = smov (!%p721_p13), 0  }
 0x306   : > { %s965_s17 = smov (!%p721_p13), 0  }
 0x30a LB: >> { %v577_v55 = vld [vmem:[%s959_s15] sm:$0xff]  ;;  %s579_s18 = sadd.s32 1, %s963_s16  ;;  %s571_s17 = sadd.s32 1, %s967_s17   ;;  %s967_s17 = sphi %s965_s17, %s571_s17   ;;  %s963_s16 = sphi %s961_s16, %s962_s16   ;;  %s959_s15 = sphi %s957_s15, %s584_s15   ;;  %s955_s14 = sphi %s953_s14, %s585_s14  }
 0x30b   : >> { %578 = vst [vmem:[%s955_s14] sm:$0xff] %v577_v55  ;;  %p580_p0 = scmp.ge.s32.totalorder %s579_s18, %s1111_s10  ;;  %p570_p1 = scmp.ge.s32.totalorder %s571_s17, %s1111_s10 }
 0x30d   : >> { %s1144_s18 = smov (%p580_p0, %s579_s18), 0  ;;  %573 = sbr.rel (!%p570_p1) target bundleno = 778 (0x30a), region = 141 }
 0x30e   : >> { %s722_s20 = sshll.u32 %s1144_s18, 3  ;;  %s962_s16 = smov %s1144_s18  }
 0x30f   : >> { %s584_s15 = scalar_lea.vmem %s565_s12, %s722_s20 [#allocation2]   ;;  %s585_s14 = scalar_lea.vmem %s567_s13, %s722_s20  }
 0x312 PF: > { %p12_p2 = scmp.ge.s32.totalorder %s1016_s22, 6   ;;  %s1136_s18 = smov %s931_s19 }
 0x313   : > { %s1137_s19 = smov %s1024_s25  ;;  %s1138_s20 = smov %s1016_s22 }
 0x314   :  { %14 = sbr.rel (!%p12_p2) target bundleno = 2 (0x2), region = 152 }

// kernel: _rmgc_forward_impl.1
= control target key start
LH: loop header
LB: loop body
LE: loop exit
PB: predicated region body
PF: predicated region fallthrough
CT: control target
= control target key end

     0   :  { %s1001_s18 = smov 0   ;;  %s1003_s19 = smov 0   ;;  %s1129_s0 = inlined_call_operand.vmem [shape: f32[50,40], index: 0, kind: input, shape index: {}]   ;;  %s1130_s1 = inlined_call_operand.vmem [shape: bf16[40,128], index: 1, kind: input, shape index: {}]   ;;  %s1131_s2 = inlined_call_operand.vmem [shape: f32[1,128], index: 2, kind: input, shape index: {}]   ;;  %s1132_s3 = inlined_call_operand.vmem [shape: bf16[128,10], index: 3, kind: input, shape index: {}]   ;;  %s1133_s4 = inlined_call_operand.vmem [shape: f32[1,10], index: 4, kind: input, shape index: {}]   ;;  %s1134_s5 = inlined_call_operand.vmem [shape: f32[50,10], index: 5, kind: output, shape index: {}]  }
   0x1   :  { %s1005_s20 = smov 0  }
   0x2 LB: > { %s1014_s21 = sadd.s32 4294967295, %s935_s20   ;;  %s1016_s22 = sadd.s32 1, %s935_s20   ;;  %s935_s20 = sphi %s1005_s20, %s1138_s20   ;;  %s931_s19 = sphi %s1003_s19, %s1137_s19   ;;  %s927_s18 = sphi %s1001_s18, %s1136_s18  }
   0x3   : > { %s129_s23 = ssub.s32 %s935_s20, %s1016_s22  ;;  %s132_s24 = sadd.s32 1, %s931_s19 }
   0x4   : > { %p130_p0 = scmp.eq.s32.totalorder %s129_s23, 0  ;;  %p142_p1 = scmp.ne.s32.totalorder %s931_s19, %s927_s18 }
   0x5   : > { %p143_p2 = scmp.eq.s32.totalorder %s1014_s21, 3  ;;  %p691_p3 = scmp.ge.s32.totalorder %s935_s20, 1 }
   0x6   : > { %s1024_s25 = scalar_select %p130_p0, %s931_s19, %s132_s24  }
   0x7   : > { %p1026_p4 = por %p143_p2, %p142_p1  ;;  %p196_p5 = scmp.lt.s32.totalorder %s935_s20, 5 }
   0x9   : > { %p197_p6 = pnand %p691_p3, %p196_p5 }
   0xa   : > { %s1037_s6 = sshll.u32 (!%p197_p6), %s1014_s21, 1  ;;  %s224_s16 = sand.u32 (!%p197_p6), 1, %s927_s18  }
   0xb   : > { %200 = sbr.rel (%p197_p6) target bundleno = 786 (0x312), region = 40  ;;  %p232_p7 = scmp.lt.s32.totalorder (!%p197_p6), %s1037_s6, 6 }
   0xc   : > { %s692_s17 = sshll.u32 (!%p197_p6), %s224_s16, 4 }
   0xd   : > { %s1082_s20 = scalar_lea.vmem (!%p197_p6), [#allocation2], %s692_s17  }
  0x10   : > { %v862_v0 = vld [vmem:[%s1130_s1 + $0x10] ss:$0 sps:$4 sm:$0xff]   ;;  %vm281_vm0 = vcmask 1043456   ;;  %v969_v1 = vmov 0.0   ;;  %vm970_vm1 = vmmov 0   ;;  %v863_v3 = vld [vmem:[%s1130_s1 + $0x8] sm:$0xff]  }
  0x11   : > { %742 = vmatprep.subr.bf16.mxu0 %v969_v1  ;;  %752 = vmatprep.subr.bf16.mxu1 %v969_v1  ;;  %v283_v2 = vsel %vm281_vm0, %v862_v0, 0  ;;  %v865_v4 = vld [vmem:[%s1132_s3 + $0x38] sm:$0xff]   ;;  %s233_s9 = scalar_select %p232_p7, %s1037_s6, 6  ;;  %v866_v5 = vld [vmem:[%s1132_s3 + $0x30] sm:$0xff]   ;;  %v864_v6 = vld [vmem:[%s1130_s1] sm:$0xff]   ;;  %vm277_vm2 = vcmask 326656  }
  0x12   : > { %748 = vmatprep.mubr.msk.bf16.mxu0 %vm970_vm1, %v969_v1  ;;  %768 = vmatprep.mubr.msk.bf16.mxu1 %vm970_vm1, %v969_v1  ;;  %v867_v7 = vld [vmem:[%s1132_s3 + $0x28] sm:$0xff]   ;;  %v868_v11 = vld [vmem:[%s1132_s3 + $0x20] sm:$0xff]   ;;  %v869_v12 = vld [vmem:[%s1132_s3 + $0x18] sm:$0xff]   ;;  %vm441_vm3 = vcmask 80896   ;;  %s476_s18 = ssub.s32 (%p1026_p4), 7, %s1037_s6 }
  0x13   : > { %743 = vmatpush3.bf16.msra.mxu0 %v283_v2  ;;  %753 = vmatpush3.bf16.msra.mxu1 %v865_v4  ;;  %s694_s14 = sshll.u32 %s233_s9, 3  ;;  %v870_v13 = vld [vmem:[%s1132_s3 + $0x10] sm:$0xff]   ;;  %v871_v14 = vld [vmem:[%s1132_s3 + $0x8] sm:$0xff]   ;;  %v872_v15 = vld [vmem:[%s1132_s3] sm:$0xff]   ;;  %p477_p8 = scmp.lt.s32.totalorder (%p1026_p4), %s476_s18, 2 }
  0x14   : > { %744 = vmatprep.subr.bf16.mxu0 %v969_v1  ;;  %754 = vmatprep.subr.bf16.mxu1 %v969_v1  ;;  %s235_s23 = scalar_lea.vmem %s1129_s0, %s694_s14  ;;  %v695_v16 = vld [vmem:[%s1131_s2] ss:$0 sm:$0xff] }
  0x15   : > { %v247_v8 = vld [vmem:[%s235_s23] sm:$0xff]  ;;  %v248_v9 = vld [vmem:[%s235_s23 + $0x8] sm:$0xff]  ;;  %s726_s23 = sshll.u32 (%p1026_p4), %s1014_s21, 4 }
  0x16   : > { %v249_v10 = vpack.c.bf16 %v248_v9, %v247_v8  ;;  %v700_v26 = vld [vmem:[%s1133_s4] ss:$0 sm:$0xff]  ;;  %s1095_s28 = scalar_lea.vmem (%p1026_p4), %s1134_s5, %s726_s23  }
  0x17   : > { %745 = vmatpush3.bf16.msra.mxu0 %v863_v3  ;;  %755 = vmatpush3.bf16.msra.mxu1 %v866_v5 }
  0x18   : > { %746 = vmatprep.subr.bf16.mxu0 %v969_v1  ;;  %756 = vmatprep.subr.bf16.mxu1 %v969_v1 }
  0x1b   : > { %747 = vmatpush3.bf16.msra.mxu0 %v864_v6  ;;  %757 = vmatpush3.bf16.msra.mxu1 %v867_v7 }
  0x1c   : > { %758 = vmatprep.subr.bf16.mxu1 %v969_v1 }
  0x1e   : > { %749 = vmatmul.mubr.msk.bf16.vlgmr.msra.gmra.mxu0 %vm277_vm2, %v249_v10 }
  0x1f   : > { %759 = vmatpush3.bf16.msra.mxu1 %v868_v11 }
  0x20   : > { %760 = vmatprep.subr.bf16.mxu1 %v969_v1 }
  0x23   : > { %761 = vmatpush3.bf16.msra.mxu1 %v869_v12 }
  0x24   : > { %762 = vmatprep.subr.bf16.mxu1 %v969_v1 }
  0x27   : > { %763 = vmatpush3.bf16.msra.mxu1 %v870_v13 }
  0x28   : > { %764 = vmatprep.subr.bf16.mxu1 %v969_v1 }
  0x2b   : > { %765 = vmatpush3.bf16.msra.mxu1 %v871_v14 }
  0x2c   : > { %766 = vmatprep.subr.bf16.mxu1 %v969_v1 }
  0x2f   : > { %767 = vmatpush3.bf16.msra.mxu1 %v872_v15 }
  0xde   : > { %v319_v17 = vpop.f32.mrf.mxu0 }
  0xdf   : > { %v320_v19 = vadd.f32 %v695_v16, %v319_v17 }
  0xe0   : > { %v750_v18 = vpop.f32.mrf.mxu0 }
  0xe1   : > { %v326_v23 = vmax.f32 %v320_v19, 0.0 }
  0xe2   : > { %v322_v20 = vpop.f32.mrf.mxu0 }
  0xe3   : > { %v323_v21 = vadd.f32 %v695_v16, %v322_v20 }
  0xe4   : > { %v751_v22 = vpop.f32.mrf.mxu0 }
  0xe5   : > { %v327_v24 = vmax.f32 %v323_v21, 0.0 }
  0xe7   : > { %v328_v25 = vpack.c.bf16 %v327_v24, %v326_v23 }
  0xe9   : > { %769 = vmatmul.mubr.bf16.vlgmr.msra.gmra.mxu1 %v328_v25 }
 0x1a9   : > { %v434_v27 = vpop.f32.mrf.mxu1 }
 0x1aa   : > { %v435_v28 = vadd.f32 %v700_v26, %v434_v27 }
 0x1ab   : > { %v770_v29 = vpop.f32.mrf.mxu1 }
 0x1ac   : > { %v442_v30 = vsel %vm441_vm3, %v435_v28, -inf }
 0x1ad   : > { %443 = vmax.xlane.f32.xlu0 %v442_v30  ;;  %v437_v31 = vpop.f32.mrf.mxu1 }
 0x1ae   : > { %v438_v32 = vadd.f32 %v700_v26, %v437_v31 }
 0x1af   : > { %v771_v33 = vpop.f32.mrf.mxu1 }
 0x1b0   : > { %v445_v34 = vsel %vm441_vm3, %v438_v32, -inf }
 0x1b1   : > { %446 = vmax.xlane.f32.xlu0 %v445_v34 }
 0x236   : > { %v444_v35 = vpop.xlane.xlu0 %443 }
 0x237   : > { %v448_v36 = vsub.f32 %v435_v28, %v444_v35 }
 0x239   : > { %v450_v37 = vmul.f32 1.442695, %v448_v36 }
 0x23a   : > { %v447_v38 = vpop.xlane.xlu0 %446 }
 0x23b   : > { %873 = vpow2.f32 %v450_v37  ;;  %v449_v39 = vsub.f32 %v438_v32, %v447_v38 }
 0x23d   : > { %v452_v40 = vmul.f32 1.442695, %v449_v39 }
 0x23f   : > { %875 = vpow2.f32 %v452_v40 }
 0x248   : > { %v874_v41 = vpop.eup %873 }
 0x249   : > { %v454_v42 = vsel %vm441_vm3, %v874_v41, 0.0 }
 0x24a   : > { %455 = vadd.xlane.f32.xlu1 %v454_v42 }
 0x24c   : > { %v876_v43 = vpop.eup %875 }
 0x24d   : > { %v457_v44 = vsel %vm441_vm3, %v876_v43, 0.0 }
 0x24e   : > { %458 = vadd.xlane.f32.xlu1 %v457_v44 }
 0x2d3   : > { %v456_v45 = vpop.xlane.xlu1 %455 }
 0x2d4   : > { %877 = vlog2.f32 %v456_v45 }
 0x2d7   : > { %v459_v46 = vpop.xlane.xlu1 %458 }
 0x2d8   : > { %879 = vlog2.f32 %v459_v46 }
 0x2e1   : > { %v878_v47 = vpop.eup %877 }
 0x2e2   : > { %v461_v48 = vmul.f32 0.6931472, %v878_v47 }
 0x2e4   : > { %v464_v49 = vsub.f32 %v448_v36, %v461_v48 }
 0x2e5   : > { %v880_v50 = vpop.eup %879 }
 0x2e6   : > { %466 = vst.msk [vmem:[%s1082_s20] sm:$0xff] %vm441_vm3, %v464_v49  ;;  %v463_v51 = vmul.f32 0.6931472, %v880_v50  ;;  %474 = sbr.rel (!%p1026_p4) target bundleno = 786 (0x312), region = 44 }
 0x2e8   : > { %v465_v52 = vsub.f32 %v449_v39, %v463_v51 }
 0x2ea   : > { %467 = vst.msk [vmem:[%s1082_s20 + $0x8] sm:$0xff] %vm441_vm3, %v465_v52 }
 0x2eb   : > { %s1140_s18 = smov (!%p477_p8, %s476_s18), 2 }
 0x2ec   : > { %s711_s29 = sshll.u32 %s1140_s18, 7 }
 0x2ed   : > { %p714_p9 = scmp.eq.s32.totalorder %s711_s29, 0 }
 0x2ee   : > { %s1101_s30 = sshrl.u32 (!%p714_p9), %s1140_s18, 1 }
 0x2ef   : > { %485 = sbr.rel (%p714_p9) target bundleno = 786 (0x312), region = 48  ;;  %p715_p10 = scmp.le.s32.totalorder (!%p714_p9), %s1101_s30, 0 }
 0x2f4   : > { %644 = sbr.rel (%p715_p10) target bundleno = 769 (0x301), region = 124  ;;  %s937_s21 = smov (!%p715_p10), %s1095_s28  }
 0x2f5   : > { %s941_s26 = smov (!%p715_p10), %s1082_s20   ;;  %s945_s6 = smov (!%p715_p10), 0  }
 0x2f6   : > { %s949_s7 = smov (!%p715_p10), 0  }
 0x2f9 LB: >> { %v550_v53 = vld [vmem:[%s943_s26] sm:$0xff]  ;;  %v552_v54 = vld [vmem:[%s943_s26 + $0x8] sm:$0xff]  ;;  %s554_s8 = sadd.s32 1, %s947_s6  ;;  %s544_s7 = sadd.s32 1, %s951_s7   ;;  %s951_s7 = sphi %s949_s7, %s544_s7   ;;  %s947_s6 = sphi %s945_s6, %s946_s6   ;;  %s943_s26 = sphi %s941_s26, %s559_s26   ;;  %s939_s21 = sphi %s937_s21, %s560_s21  }
 0x2fa   : >> { %551 = vst [vmem:[%s939_s21] sm:$0xff] %v550_v53  ;;  %553 = vst [vmem:[%s939_s21 + $0x8] sm:$0xff] %v552_v54  ;;  %p555_p11 = scmp.ge.s32.totalorder %s554_s8, %s1101_s30  ;;  %p543_p12 = scmp.ge.s32.totalorder %s544_s7, %s1101_s30 }
 0x2fc   : >> { %s1142_s8 = smov (%p555_p11, %s554_s8), 0  ;;  %546 = sbr.rel (!%p543_p12) target bundleno = 761 (0x2f9), region = 130 }
 0x2fd   : >> { %s716_s9 = sshll.u32 %s1142_s8, 4  ;;  %s946_s6 = smov %s1142_s8  }
 0x2fe   : >> { %s559_s26 = scalar_lea.vmem %s1082_s20, %s716_s9 [#allocation2]   ;;  %s560_s21 = scalar_lea.vmem %s1095_s28, %s716_s9  }
 0x301 PF: > { %s1111_s10 = sand.u32 1, %s1140_s18   ;;  %s727_s11 = sshll.u32 %s1101_s30, 4 }
 0x302   : > { %s565_s12 = scalar_lea.vmem %s1082_s20, %s727_s11 [#allocation2]   ;;  %s567_s13 = scalar_lea.vmem %s1095_s28, %s727_s11  }
 0x303   : > { %p721_p13 = scmp.le.s32.totalorder %s1111_s10, 0 }
 0x304   : > { %s953_s14 = smov (!%p721_p13), %s567_s13   ;;  %s957_s15 = smov (!%p721_p13), %s565_s12  }
 0x305   : > { %658 = sbr.rel (%p721_p13) target bundleno = 786 (0x312), region = 135  ;;  %s961_s16 = smov (!%p721_p13), 0  }
 0x306   : > { %s965_s17 = smov (!%p721_p13), 0  }
 0x30a LB: >> { %v577_v55 = vld [vmem:[%s959_s15] sm:$0xff]  ;;  %s579_s18 = sadd.s32 1, %s963_s16  ;;  %s571_s17 = sadd.s32 1, %s967_s17   ;;  %s967_s17 = sphi %s965_s17, %s571_s17   ;;  %s963_s16 = sphi %s961_s16, %s962_s16   ;;  %s959_s15 = sphi %s957_s15, %s584_s15   ;;  %s955_s14 = sphi %s953_s14, %s585_s14  }
 0x30b   : >> { %578 = vst [vmem:[%s955_s14] sm:$0xff] %v577_v55  ;;  %p580_p0 = scmp.ge.s32.totalorder %s579_s18, %s1111_s10  ;;  %p570_p1 = scmp.ge.s32.totalorder %s571_s17, %s1111_s10 }
 0x30d   : >> { %s1144_s18 = smov (%p580_p0, %s579_s18), 0  ;;  %573 = sbr.rel (!%p570_p1) target bundleno = 778 (0x30a), region = 141 }
 0x30e   : >> { %s722_s20 = sshll.u32 %s1144_s18, 3  ;;  %s962_s16 = smov %s1144_s18  }
 0x30f   : >> { %s584_s15 = scalar_lea.vmem %s565_s12, %s722_s20 [#allocation2]   ;;  %s585_s14 = scalar_lea.vmem %s567_s13, %s722_s20  }
 0x312 PF: > { %p12_p2 = scmp.ge.s32.totalorder %s1016_s22, 6   ;;  %s1136_s18 = smov %s931_s19 }
 0x313   : > { %s1137_s19 = smov %s1024_s25  ;;  %s1138_s20 = smov %s1016_s22 }
 0x314   :  { %14 = sbr.rel (!%p12_p2) target bundleno = 2 (0x2), region = 152 }

</bundles_post_ra>
